<compile_context>
chip_gen: v5e
topology: v5e:2x2
jax: 0.10.0
libtpu: 0.0.40
codegen_flags: <defaults>
</compile_context>

<pallas_src>
import functools

import jax
import jax.numpy as jnp
from jax.experimental import pallas as pl
from jax.experimental.pallas import tpu as pltpu


# ----------------------------------------------------------------------------- glue
def _im2col_T(x_cbhw, k):
    """Channel-major im2col.

    x_cbhw: [C, B, H, W] -> patches [C*k*k, B*Ho*Wo].
    Row ordering (c, ky, kx); column ordering (b, y, x).  The large spatial
    axis stays last so it lands on the TPU lane dimension.
    """
    C, B, H, W = x_cbhw.shape
    Ho, Wo = H - k + 1, W - k + 1
    cols = []
    for ky in range(k):
        for kx in range(k):
            cols.append(x_cbhw[:, :, ky:ky + Ho, kx:kx + Wo])   # [C, B, Ho, Wo]
    p = jnp.stack(cols, axis=1)                                 # [C, k*k, B, Ho, Wo]
    return p.reshape(C * k * k, B * Ho * Wo)


def _choose_tile(M, bytes_per_col, cap=1024, vmem_budget=24 * 1024 * 1024):
    """Pick a lane-tile size.

    M is padded up to a multiple of 128 (Mp).  The tile is a multiple of 128
    dividing Mp that (a) fits a conservative double-buffered VMEM budget sized
    for v7x (32 MiB scoped default / 64 MiB physical), (b) is as large as
    possible (<= cap), and (c) leaves >= 2 grid blocks so "parallel" can shard
    across v7x's two TensorCores — unless that would force the tile below 256.
    """
    Mp = ((M + 127) // 128) * 128
    divs = [t for t in range(128, min(Mp, cap) + 1, 128)
            if Mp % t == 0 and 2 * t * bytes_per_col <= vmem_budget]
    if not divs:
        divs = [128]
    multi = [t for t in divs if Mp // t >= 2]
    pick_from = [t for t in multi if t >= 256] or multi or divs
    return max(pick_from), Mp


# ----------------------------------------------------------------------------- kernels
def _e_kernel(x_ref, p_ref, w_ref, b_ref, e_ref):
    # e = relu(x - tanh(Wt @ patches(r_pad) + bt)); output [Ce, tm] is lane-dense.
    td = jnp.dot(w_ref[...], p_ref[...], preferred_element_type=jnp.float32)
    e_ref[...] = jnp.maximum(x_ref[...] - jnp.tanh(td + b_ref[...]), 0.0)


def _r_kernel(r_ref, p_ref, w_ref, b_ref, o_ref, *, nu, mu):
    # r_new = nu*r + mu*(Wc @ patches(e) + bc)         (td_err is None variant)
    conv = jnp.dot(w_ref[...], p_ref[...], preferred_element_type=jnp.float32)
    o_ref[...] = nu * r_ref[...] + mu * (conv + b_ref[...])


def _r_kernel_td(r_ref, p_ref, t_ref, w_ref, b_ref, o_ref, *, nu, mu, eta):
    # r_new = nu*r + mu*(Wc @ patches(e) + bc) - eta*td_err
    conv = jnp.dot(w_ref[...], p_ref[...], preferred_element_type=jnp.float32)
    o_ref[...] = nu * r_ref[...] + mu * (conv + b_ref[...]) - eta * t_ref[...]


# ----------------------------------------------------------------------------- runner
def _run_gemm(kernel_fn, out_rows, lane_arrays, shared_arrays, *, transcendental=False):
    """out[out_rows, M] f32, with lane_arrays [rows_i, M] tiled along lanes.

    shared_arrays (weights / biases) stay VMEM-resident (constant index map).
    M is zero-padded up to a multiple of 128; the result is sliced back.
    """
    M = lane_arrays[0].shape[1]
    bytes_per_col = (sum(a.shape[0] * a.dtype.itemsize for a in lane_arrays)
                     + out_rows * 4)
    tm, Mp = _choose_tile(M, bytes_per_col)
    if Mp != M:
        lane_arrays = [jnp.pad(a, ((0, 0), (0, Mp - M))) for a in lane_arrays]
    grid = (Mp // tm,)

    in_specs = ([pl.BlockSpec((a.shape[0], tm), lambda i: (0, i)) for a in lane_arrays]
                + [pl.BlockSpec(a.shape, lambda i: (0, 0)) for a in shared_arrays])
    out_spec = pl.BlockSpec((out_rows, tm), lambda i: (0, i))

    k_dim = max(a.shape[0] for a in lane_arrays)
    shared_bytes = sum(a.size * a.dtype.itemsize for a in shared_arrays)
    cost = pl.CostEstimate(
        flops=2 * out_rows * k_dim * Mp,
        transcendentals=(out_rows * Mp) if transcendental else 0,
        bytes_accessed=bytes_per_col * Mp + shared_bytes,
    )
    vmem_limit = int(min(64 << 20,
                         max(4 * tm * bytes_per_col + 4 * shared_bytes + (2 << 20),
                             8 << 20)))

    out = pl.pallas_call(
        kernel_fn,
        out_shape=jax.ShapeDtypeStruct((out_rows, Mp), jnp.float32),
        grid_spec=pltpu.PrefetchScalarGridSpec(
            num_scalar_prefetch=0,
            grid=grid,
            in_specs=in_specs,
            out_specs=out_spec,
        ),
        compiler_params=pltpu.CompilerParams(
            dimension_semantics=("parallel",),
            vmem_limit_bytes=vmem_limit,
        ),
        cost_estimate=cost,
    )(*lane_arrays, *shared_arrays)
    return out[:, :M] if Mp != M else out


# ----------------------------------------------------------------------------- module
class PCLayerPallas:
    def __init__(self, e_shape, r_shape, kernel, nu, mu, eta,
                 maxpool=1, padding=0, key=None):
        assert maxpool == 1 and padding == 0, "only maxpool=1, padding=0 supported"
        self.e_shape = e_shape     # (Ce, He, We)
        self.r_shape = r_shape     # (Cr, Hr, Wr)
        self.k = kernel
        self.nu, self.mu, self.eta = float(nu), float(mu), float(eta)

        Ce, Cr, k = e_shape[0], r_shape[0], kernel
        if key is None:
            key = jax.random.PRNGKey(0)
        k0, k1, k2, k3 = jax.random.split(key, 4)

        # Conv2d(Ce -> Cr, k):  weight [Cr, Ce, k, k], bias [Cr]
        sc = 1.0 / (Ce * k * k) ** 0.5
        self.Wc = jax.random.uniform(k0, (Cr, Ce, k, k), jnp.float32, -sc, sc)
        self.bc = jax.random.uniform(k1, (Cr,), jnp.float32, -sc, sc)
        # ConvTranspose2d(Cr -> Ce, k): weight [Cr, Ce, k, k], bias [Ce]
        st = 1.0 / (Cr * k * k) ** 0.5
        self.Wt = jax.random.uniform(k2, (Cr, Ce, k, k), jnp.float32, -st, st)
        self.bt = jax.random.uniform(k3, (Ce,), jnp.float32, -st, st)

        # Pre-flattened bf16 GEMM weights stored as [C_out, C_in*k*k] so the
        # in-kernel matmul W @ patches gives a lane-dense [C_out, tm] output.
        # Column ordering (c_in, ky, kx) matches _im2col_T's row ordering.
        self.Wc_mat = self.Wc.reshape(Cr, Ce * k * k).astype(jnp.bfloat16)
        Wt_flip = self.Wt[:, :, ::-1, ::-1]                               # spatial flip
        self.Wt_mat = (Wt_flip.transpose(1, 0, 2, 3)
                       .reshape(Ce, Cr * k * k).astype(jnp.bfloat16))
        self.bt2d = self.bt[:, None]     # [Ce, 1] f32 (lane-broadcast in kernel)
        self.bc2d = self.bc[:, None]     # [Cr, 1] f32

        self._r_kernel = functools.partial(_r_kernel, nu=self.nu, mu=self.mu)
        self._r_kernel_td = functools.partial(_r_kernel_td,
                                              nu=self.nu, mu=self.mu, eta=self.eta)

    def init_vars(self, batch_size):
        e = jnp.zeros((batch_size,) + tuple(self.e_shape), jnp.float32)
        r = jnp.zeros((batch_size,) + tuple(self.r_shape), jnp.float32)
        return e, r

    def forward(self, x, e, r, td_err=None):
        del e  # like the PyTorch module, the incoming e is overwritten
        k = self.k
        Ce, He, We = self.e_shape
        Cr, Hr, Wr = self.r_shape
        B = x.shape[0]

        # ---- e = relu(x - tanh(convT(r))) -----------------------------------
        # ConvTranspose2d(stride=1, pad=0) == conv of zero-padded r with the
        # spatially flipped kernel.  Patches are channel-major & bf16 so the
        # dominant operand is half-width and lane-dense.
        r_cbhw = r.transpose(1, 0, 2, 3)                                  # [Cr, B, Hr, Wr]
        r_pad = jnp.pad(r_cbhw, ((0, 0), (0, 0), (k - 1, k - 1), (k - 1, k - 1)))
        p_t = _im2col_T(r_pad.astype(jnp.bfloat16), k)                    # [Cr*k*k, B*He*We]
        x_t = x.transpose(1, 0, 2, 3).reshape(Ce, B * He * We)            # [Ce, B*He*We]
        e_t = _run_gemm(_e_kernel, Ce, [x_t, p_t],
                        [self.Wt_mat, self.bt2d], transcendental=True)

        # ---- r = nu*r + mu*conv(e) [- eta*td_err] ---------------------------
        e_cbhw = e_t.reshape(Ce, B, He, We)
        p_c = _im2col_T(e_cbhw.astype(jnp.bfloat16), k)                   # [Ce*k*k, B*Hr*Wr]
        r_t = r_cbhw.reshape(Cr, B * Hr * Wr)
        if td_err is None:
            # No td_err: dedicated kernel variant -> no zero tensor is streamed.
            r_new_t = _run_gemm(self._r_kernel, Cr, [r_t, p_c],
                                [self.Wc_mat, self.bc2d])
        else:
            t_t = td_err.transpose(1, 0, 2, 3).reshape(Cr, B * Hr * Wr)
            r_new_t = _run_gemm(self._r_kernel_td, Cr, [r_t, p_c, t_t],
                                [self.Wc_mat, self.bc2d])

        e_new = e_cbhw.transpose(1, 0, 2, 3)                              # NCHW
        r_new = r_new_t.reshape(Cr, B, Hr, Wr).transpose(1, 0, 2, 3)      # NCHW
        return e_new, r_new


# ----------------------------------------------------------------------------- main
if __name__ == "__main__":
    key = jax.random.PRNGKey(0)
    k_param, k_x, k_r, k_t = jax.random.split(key, 4)

    e_shape = (4, 16, 16)     # (Ce, He, We)
    r_shape = (8, 12, 12)     # (Cr, Hr, Wr) : 16 - 5 + 1 = 12
    kernel = 5
    nu, mu, eta = 0.9, 0.1, 0.05
    B = 2

    layer = PCLayerPallas(e_shape, r_shape, kernel, nu, mu, eta, key=k_param)
    x = jax.random.normal(k_x, (B,) + e_shape, jnp.float32)
    e0, _ = layer.init_vars(B)
    r0 = jax.random.normal(k_r, (B,) + r_shape, jnp.float32)
    td = jax.random.normal(k_t, (B,) + r_shape, jnp.float32)

    e_new, r_new = layer.forward(x, e0, r0, td_err=None)
    e_new2, r_new2 = layer.forward(x, e0, r0, td_err=td)
    jax.block_until_ready((e_new, r_new, e_new2, r_new2))

    # --------- pure-JAX reference (lax convolutions, NCHW, f32) --------------
    dn = ("NCHW", "OIHW", "NCHW")
    Wt_conv = jnp.flip(layer.Wt, axis=(2, 3)).transpose(1, 0, 2, 3)   # [Ce, Cr, k, k]
    td_ref = jax.lax.conv_general_dilated(
        r0, Wt_conv, (1, 1),
        padding=[(kernel - 1, kernel - 1)] * 2, dimension_numbers=dn,
        precision=jax.lax.Precision.HIGHEST) + layer.bt[None, :, None, None]
    e_ref = jnp.maximum(x - jnp.tanh(td_ref), 0.0)
    conv_ref = jax.lax.conv_general_dilated(
        e_ref, layer.Wc, (1, 1), padding="VALID", dimension_numbers=dn,
        precision=jax.lax.Precision.HIGHEST) + layer.bc[None, :, None, None]
    r_ref = nu * r0 + mu * conv_ref
    r_ref2 = r_ref - eta * td

    assert e_new.shape == (B,) + e_shape and r_new.shape == (B,) + r_shape
    assert jnp.allclose(e_new, e_ref, atol=2e-2, rtol=2e-2)
    assert jnp.allclose(r_new, r_ref, atol=2e-2, rtol=2e-2)
    assert jnp.allclose(e_new2, e_ref, atol=2e-2, rtol=2e-2)
    assert jnp.allclose(r_new2, r_ref2, atol=2e-2, rtol=2e-2)

    print("KERNEL_OK")
</pallas_src>

<mosaic_0001>
module attributes {stable_mosaic.version = 11 : i64} {
  func.func @_e_kernel(%arg0: i32, %arg1: memref<4x256xf32, #tpu.memory_space<vmem>>, %arg2: memref<200x256xbf16, #tpu.memory_space<vmem>>, %arg3: memref<4x200xbf16, #tpu.memory_space<vmem>>, %arg4: memref<4x1xf32, #tpu.memory_space<vmem>>, %arg5: memref<4x256xf32, #tpu.memory_space<vmem>>) attributes {dimension_semantics = [#tpu.dimension_semantics<parallel>], iteration_bounds = array<i64: 2>, scalar_prefetch = 0 : i64, scratch_operands = 0 : i64, tpu.core_type = #tpu.core_type<tc>, window_params = [{transform_indices = @transform_0, window_bounds = array<i64: 4, 256>}, {transform_indices = @transform_1, window_bounds = array<i64: 200, 256>}, {pipeline_mode = #tpu.pipeline_mode<synchronous>, transform_indices = @transform_2, window_bounds = array<i64: 4, 200>}, {pipeline_mode = #tpu.pipeline_mode<synchronous>, transform_indices = @transform_3, window_bounds = array<i64: 4, 1>}, {transform_indices = @transform_4, window_bounds = array<i64: 4, 256>}]} {
    %c0 = arith.constant 0 : index
    %c0_0 = arith.constant 0 : index
    %0 = vector.load %arg3[%c0, %c0_0] : memref<4x200xbf16, #tpu.memory_space<vmem>>, vector<4x200xbf16>
    %c0_1 = arith.constant 0 : index
    %c0_2 = arith.constant 0 : index
    %1 = vector.load %arg2[%c0_1, %c0_2] : memref<200x256xbf16, #tpu.memory_space<vmem>>, vector<200x256xbf16>
    %cst = arith.constant dense<0.000000e+00> : vector<4x256xf32>
    %2 = tpu.matmul %0, %1, %cst {dimension_numbers = #tpu.dot_dimension_numbers<[1], [0], [0], [1], [0, 0, 1, 1], [], []>} : vector<4x200xbf16>, vector<200x256xbf16>, vector<4x256xf32> -> vector<4x256xf32>
    %c0_3 = arith.constant 0 : index
    %c0_4 = arith.constant 0 : index
    %3 = vector.load %arg1[%c0_3, %c0_4] : memref<4x256xf32, #tpu.memory_space<vmem>>, vector<4x256xf32>
    %c0_5 = arith.constant 0 : index
    %c0_6 = arith.constant 0 : index
    %4 = vector.load %arg4[%c0_5, %c0_6] : memref<4x1xf32, #tpu.memory_space<vmem>>, vector<4x1xf32>
    %5 = vector.broadcast %4 : vector<4x1xf32> to vector<4x256xf32>
    %6 = arith.addf %2, %5 : vector<4x256xf32>
    %7 = math.tanh %6 : vector<4x256xf32>
    %8 = arith.subf %3, %7 : vector<4x256xf32>
    %cst_7 = arith.constant 0.000000e+00 : f32
    %9 = vector.broadcast %cst_7 : f32 to vector<4x256xf32>
    %10 = arith.maximumf %8, %9 : vector<4x256xf32>
    %c0_8 = arith.constant 0 : index
    %c0_9 = arith.constant 0 : index
    %11 = vector.load %arg5[%c0_8, %c0_9] : memref<4x256xf32, #tpu.memory_space<vmem>>, vector<4x256xf32>
    tpu.vector_store %arg5[%c0_8, %c0_9], %10 {strides = array<i32>} : memref<4x256xf32, #tpu.memory_space<vmem>>, vector<4x256xf32>,
    return
  }
  func.func @transform_0(%arg0: i32) -> (i32, i32) {
    %c0_i32 = arith.constant 0 : i32
    %c0_i32_0 = arith.constant 0 : i32
    return %c0_i32, %arg0 : i32, i32
  }
  func.func @transform_1(%arg0: i32) -> (i32, i32) {
    %c0_i32 = arith.constant 0 : i32
    %c0_i32_0 = arith.constant 0 : i32
    return %c0_i32, %arg0 : i32, i32
  }
  func.func @transform_2(%arg0: i32) -> (i32, i32) {
    %c0_i32 = arith.constant 0 : i32
    %c0_i32_0 = arith.constant 0 : i32
    %c0_i32_1 = arith.constant 0 : i32
    return %c0_i32, %c0_i32_0 : i32, i32
  }
  func.func @transform_3(%arg0: i32) -> (i32, i32) {
    %c0_i32 = arith.constant 0 : i32
    %c0_i32_0 = arith.constant 0 : i32
    %c0_i32_1 = arith.constant 0 : i32
    return %c0_i32, %c0_i32_0 : i32, i32
  }
  func.func @transform_4(%arg0: i32) -> (i32, i32) {
    %c0_i32 = arith.constant 0 : i32
    %c0_i32_0 = arith.constant 0 : i32
    return %c0_i32, %arg0 : i32, i32
  }
}

</mosaic_0001>

<bundles_post_ra>
// kernel: tpu_custom_call.1
= control target key start
LH: loop header
LB: loop body
LE: loop exit
PB: predicated region body
PF: predicated region fallthrough
CT: control target
= control target key end

     0   :  { %9 = vsyncpa [#allocation3], 0  ;;  %s1196_s0 = inlined_call_operand.hbm [shape: f32[4,512], index: 0, kind: input, shape index: {}]   ;;  %s1197_s1 = inlined_call_operand.hbm [shape: bf16[200,512], index: 1, kind: input, shape index: {}]   ;;  %s1198_s2 = inlined_call_operand.vmem [shape: bf16[4,200], index: 2, kind: input, shape index: {}]   ;;  %s1199_s3 = inlined_call_operand.vmem [shape: f32[4,1], index: 3, kind: input, shape index: {}]   ;;  %s1200_s4 = inlined_call_operand.hbm [shape: f32[4,512], index: 4, kind: output, shape index: {}]  }
   0x1   :  { %11 = vsyncpa [#allocation3 + $0x1], 0 }
   0x2   :  { %12 = vsyncpa [#allocation6], 0 }
   0x3   :  { %14 = vsyncpa [#allocation6 + $0x1], 0 }
   0x4   :  { %15 = vsyncpa [#allocation4], 0 }
   0x5   :  { %17 = vsyncpa [#allocation4 + $0x1], 0  ;;  %s971_s15 = smov 0   ;;  %s973_s16 = smov 0  }
   0x6   :  { %s975_s17 = smov 0   ;;  %s977_s18 = smov 0  }
   0x7 LB: > { %1202 = sst [smem:[#allocation11_spill]] %s936_s17  ;;  %s992_s19 = sadd.s32 4294967295, %s940_s18   ;;  %s940_s18 = sphi %s977_s18, %s1214_s18   ;;  %s936_s17 = sphi %s975_s17, %s1211_s17   ;;  %s932_s16 = sphi %s973_s16, %s1213_s16   ;;  %s928_s15 = sphi %s971_s15, %s1212_s15  }
   0x8   : > { %s607_s20 = sadd.s32 4294967294, %s940_s18   ;;  %s996_s21 = sadd.s32 1, %s940_s18  }
   0x9   : > { %s30_s22 = sadd.s32 1, %s936_s17  ;;  %s27_s23 = ssub.s32 %s940_s18, %s996_s21 }
   0xa   : > { %p37_p0 = scmp.ne.s32.totalorder %s936_s17, %s932_s16  ;;  %p28_p1 = scmp.eq.s32.totalorder %s27_s23, 0 }
   0xb   : > { %p38_p2 = scmp.eq.s32.totalorder %s940_s18, 0  ;;  %p43_p3 = scmp.ne.s32.totalorder %s932_s16, %s928_s15 }
   0xc   : > { %p44_p4 = scmp.eq.s32.totalorder %s992_s19, 0  ;;  %p135_p7 = scmp.eq.s32.totalorder %s992_s19, 1 }
   0xd   : > { %s1008_s24 = scalar_select %p28_p1, %s936_s17, %s30_s22  }
   0xe   : > { %p1010_p5 = por %p38_p2, %p37_p0  ;;  %p1014_p6 = por %p44_p4, %p43_p3 }
   0xf   : > { %1203 = sst [smem:[#allocation12_spill]] %s1008_s24  ;;  %p141_p8 = scmp.eq.s32.totalorder %s607_s20, 1 }
  0x10   : > { %p609_p9 = scmp.ge.s32.totalorder %s940_s18, 2  ;;  %p767_p10 = scmp.lt.s32.totalorder %s940_s18, 2 }
  0x11   : > { %p1021_p11 = por %p135_p7, %p37_p0  ;;  %p1025_p12 = por %p141_p8, %p43_p3 }
  0x12   : > { %s1030_s29 = sand.u32 1, %s936_s17   ;;  %s721_s30 = sshll.u32 %s940_s18, 3 }
  0x13   : > { %s610_s5 = sshll.u32 %s1030_s29, 3  ;;  %s176_s8 = scalar_lea.hbm %s1196_s0, %s721_s30 }
  0x14   : > { %s178_s9 = sshll.u32 %s176_s8, 4  ;;  %s171_s10 = scalar_lea.vmem [#allocation2], %s610_s5  ;;  %s179_s9 = int_to_ptr.hbm [resolvable:$true] %s178_s9 }
  0x15   : > { %s180_s11 = sshll.u32 %s171_s10, 4  ;;  %p1039_p13 = pnand %p767_p10, %p1010_p5  ;;  %s181_s11 = int_to_ptr.vmem [resolvable:$true] %s180_s11 }
  0x16   : > { %s748_s13 = smul.u32 200, %s1030_s29  ;;  %s196_s22 = scalar_lea.hbm %s1197_s1, %s721_s30 }
  0x17   : > { %s197_s23 = sshll.u32 %s196_s22, 4  ;;  %s168_s6 = scalar_lea.sflag [#allocation3], %s1030_s29  ;;  %s198_s23 = int_to_ptr.hbm [resolvable:$true] %s197_s23 }
  0x18   : > { %s810_s7 = sshra.s32 %s179_s9, 4  ;;  %p814_p1 = pneg %p1039_p13  ;;  %s811_s7 = int_to_ptr.hbm [resolvable:$true] %s810_s7 }
  0x19   : > { %s812_s5 = scalar_lea.hbm %s811_s7, 8  ;;  %s817_s10 = scalar_lea.hbm %s1196_s0, 16 }
  0x1a   : > { %p813_p0 = scmp.ne.s32.totalorder %s811_s7, %s812_s5  ;;  %p818_p4 = scmp.lt.s32.totalorder %s811_s7, %s1196_s0 }
  0x1b   : > { %p819_p5 = scmp.lt.s32.totalorder %s817_s10, %s812_s5 }
  0x1c   : > { %p815_p2 = pnand %p814_p1, %p813_p0 }
  0x1d   : > { %p820_p7 = por %p819_p5, %p818_p4 }
  0x1e   : > { %p816_p3 = pneg %p815_p2 }
  0x20   : > { %p821_p8 = pnand %p820_p7, %p816_p3 }
  0x22   : > { %824 = shalt.err (!%p821_p8)
}
  0x23   : > { %759 = dma.hbm_to_vmem [thread:$0]  (!%p1039_p13), %s179_s9, 128, %s181_s11, %s168_s6  }
  0x24   : > { %p615_p10 = scmp.ge.s32.totalorder %s940_s18, 1  ;;  %p207_p0 = scmp.lt.s32.totalorder %s940_s18, 3 }
  0x25   : > { %s191_s30 = scalar_lea.vmem [#allocation5], %s748_s13  ;;  %s188_s17 = scalar_lea.sflag [#allocation6], %s1030_s29 }
  0x26   : > { %s199_s14 = sshll.u32 %s191_s30, 4  ;;  %p1063_p2 = pnand %p615_p10, %p207_p0  ;;  %s200_s14 = int_to_ptr.vmem [resolvable:$true] %s199_s14 }
  0x27   : > { %s840_s24 = sshra.s32 %s198_s23, 4  ;;  %s847_s6 = scalar_lea.hbm %s1197_s1, 400  ;;  %s841_s24 = int_to_ptr.hbm [resolvable:$true] %s840_s24 }
  0x28   : > { %s842_s22 = scalar_lea.hbm %s841_s24, 200  ;;  %p848_p7 = scmp.lt.s32.totalorder %s841_s24, %s1197_s1 }
  0x29   : > { %p843_p3 = scmp.ne.s32.totalorder %s841_s24, %s842_s22  ;;  %p849_p8 = scmp.lt.s32.totalorder %s847_s6, %s842_s22 }
  0x2b   : > { %p845_p4 = pnand %p843_p3, %p814_p1  ;;  %p850_p10 = por %p849_p8, %p848_p7 }
  0x2d   : > { %p846_p5 = pneg %p845_p4 }
  0x2f   : > { %p851_p0 = pnand %p850_p10, %p846_p5 }
  0x31   : > { %854 = shalt.err (!%p851_p0)
}
  0x32   : > { %s942_s29 = smov 256   ;;  %s943_s5 = smov 128  }
  0x33   : > { %s944_s25 = smov 8   ;;  %211 = sbr.rel (%p1063_p2) target bundleno = 249 (0xf9), region = 36 }
  0x34   : > { %762 = dma.hbm_to_vmem [thread:$0]  (!%p1039_p13), %s198_s23, 3200, %s200_s14, %s188_s17, %s942_s29, %s943_s5, %s944_s25  }
  0x35   : > { %s1082_s8 = sand.u32 (!%p1063_p2), 1, %s932_s16  }
  0x36   : > { %s616_s10 = sshll.u32 (!%p1063_p2), %s1082_s8, 3  ;;  %s214_s30 = scalar_lea.sflag (!%p1063_p2), [#allocation3], %s1082_s8 }
  0x37   : > { %s1088_s24 = scalar_lea.vmem (!%p1063_p2), [#allocation2], %s616_s10 }
  0x38   : > { %915 = dma.done.wait (%p1014_p6), %s214_s30, 128  }
  0x39   : > { %917 = vsyncadd (%p1014_p6), %s214_s30, 4294967168  ;;  %s749_s12 = smul.u32 200, %s1082_s8  ;;  %s224_s23 = scalar_lea.sflag [#allocation6], %s1082_s8 }
  0x3b   : > { %s1096_s14 = scalar_lea.vmem [#allocation5], %s749_s12 }
  0x3c   : > { %919 = dma.done.wait (%p1014_p6), %s224_s23, 3200  }
  0x3d   : > { %921 = vsyncadd (%p1014_p6), %s224_s23, 4294964096  ;;  %v676_v0 = vld [vmem:[%s1096_s14 + $0x70] sm:$0xf]  ;;  %v738_v1 = vld [vmem:[%s1096_s14 + $0x74] sm:$0xf0]  ;;  %vm428_vm0 = vcmask 1043456  }
  0x3e   : > { %v737_v2 = vld [vmem:[%s1096_s14 + $0x74] sm:$0xf]  ;;  %v677_v3 = vor.u32 %v738_v1, %v676_v0  ;;  %v678_v4 = vld [vmem:[%s1096_s14 + $0x78] sm:$0xf0]  ;;  %v668_v5 = vld [vmem:[%s1096_s14 + $0x60] sm:$0xf] }
  0x3f   : > { %v736_v6 = vld [vmem:[%s1096_s14 + $0x64] sm:$0xf0]  ;;  %v681_v7 = vor.u32 %v737_v2, %v678_v4  ;;  %v735_v8 = vld [vmem:[%s1096_s14 + $0x64] sm:$0xf]  ;;  %v670_v9 = vld [vmem:[%s1096_s14 + $0x68] sm:$0xf0] }
  0x40   : > { %v287_v10 = vld [vmem:[%s1096_s14 + $0xc0] sm:$0xff]  ;;  %435 = vmatpush.bf16.msra.mxu0 %v677_v3  ;;  %v669_v11 = vor.u32 %v736_v6, %v668_v5  ;;  %v673_v14 = vor.u32 %v735_v8, %v670_v9  ;;  %v660_v15 = vld [vmem:[%s1096_s14 + $0x50] sm:$0xf]  ;;  %v734_v16 = vld [vmem:[%s1096_s14 + $0x54] sm:$0xf0]  ;;  %v945_v1 = vmov 0  }
  0x41   : > { %v374_v12 = vunpack.c.h.b16 %v287_v10  ;;  %v373_v13 = vunpack.c.l.b16 %v287_v10  ;;  %461 = vmatpush.bf16.msra.mxu2 %v681_v7  ;;  %v733_v17 = vld [vmem:[%s1096_s14 + $0x54] sm:$0xf]  ;;  %v662_v19 = vld [vmem:[%s1096_s14 + $0x58] sm:$0xf0]  ;;  %v661_v24 = vor.u32 %v734_v16, %v660_v15  ;;  %v652_v25 = vld [vmem:[%s1096_s14 + $0x40] sm:$0xf]  ;;  %805 = vset.pattern.permute.xlu0 %v945_v1 }
  0x42   : > { %v745_v20 = vld [vmem:[%s1096_s14 + $0xb4] sm:$0xf]  ;;  %v710_v21 = vld [vmem:[%s1096_s14 + $0xb8] sm:$0xf0]  ;;  %v732_v26 = vld [vmem:[%s1096_s14 + $0x44] sm:$0xf0]  ;;  %v665_v28 = vor.u32 %v733_v17, %v662_v19 }
  0x43   : > { %v400_v18 = vpack.c.b16 %v374_v12, %v374_v12  ;;  %v399_v22 = vpack.c.b16 %v373_v13, %v373_v13  ;;  %v713_v29 = vor.u32 %v745_v20, %v710_v21  ;;  %v731_v30 = vld [vmem:[%s1096_s14 + $0x44] sm:$0xf]  ;;  %v654_v31 = vld [vmem:[%s1096_s14 + $0x48] sm:$0xf0]  ;;  %v708_v32 = vld [vmem:[%s1096_s14 + $0xb0] sm:$0xf]  ;;  %v653_v37 = vor.u32 %v732_v26, %v652_v25 }
  0x44   : > { %436 = vmatpush.bf16.msra.mxu0 %v669_v11  ;;  %v743_v33 = vld [vmem:[%s1096_s14 + $0xa4] sm:$0xf]  ;;  %v702_v34 = vld [vmem:[%s1096_s14 + $0xa8] sm:$0xf0]  ;;  %v746_v35 = vld [vmem:[%s1096_s14 + $0xb4] sm:$0xf0]  ;;  %v657_v40 = vor.u32 %v731_v30, %v654_v31 }
  0x45   : > { %v433_v23 = vsel %vm428_vm0, %v400_v18, 0  ;;  %v430_v27 = vsel %vm428_vm0, %v399_v22, 0  ;;  %462 = vmatpush.bf16.msra.mxu2 %v673_v14  ;;  %v709_v36 = vor.u32 %v746_v35, %v708_v32  ;;  %v700_v38 = vld [vmem:[%s1096_s14 + $0xa0] sm:$0xf]  ;;  %v744_v39 = vld [vmem:[%s1096_s14 + $0xa4] sm:$0xf0]  ;;  %v705_v41 = vor.u32 %v743_v33, %v702_v34 }
  0x46   : > { %477 = vmatpush.bf16.msra.mxu3 %v433_v23  ;;  %451 = vmatpush.bf16.msra.mxu1 %v430_v27  ;;  %v644_v42 = vld [vmem:[%s1096_s14 + $0x30] sm:$0xf]  ;;  %v730_v43 = vld [vmem:[%s1096_s14 + $0x34] sm:$0xf0]  ;;  %v729_v44 = vld [vmem:[%s1096_s14 + $0x34] sm:$0xf]  ;;  %v701_v48 = vor.u32 %v744_v39, %v700_v38 }
  0x47   : > { %v646_v45 = vld [vmem:[%s1096_s14 + $0x38] sm:$0xf0]  ;;  %v741_v46 = vld [vmem:[%s1096_s14 + $0x94] sm:$0xf]  ;;  %v262_v49 = vld [vmem:[%s1198_s2] sm:$0xf]  ;;  %v645_v52 = vor.u32 %v730_v43, %v644_v42 }
  0x48   : > { %437 = vmatpush.bf16.msra.mxu0 %v661_v24  ;;  %v694_v47 = vld [vmem:[%s1096_s14 + $0x98] sm:$0xf0]  ;;  %v692_v50 = vld [vmem:[%s1096_s14 + $0x90] sm:$0xf]  ;;  %v742_v51 = vld [vmem:[%s1096_s14 + $0x94] sm:$0xf0]  ;;  %v649_v55 = vor.u32 %v729_v44, %v646_v45 }
  0x49   : > { %463 = vmatpush.bf16.msra.mxu2 %v665_v28  ;;  %v636_v53 = vld [vmem:[%s1096_s14 + $0x20] sm:$0xf]  ;;  %v728_v54 = vld [vmem:[%s1096_s14 + $0x24] sm:$0xf0]  ;;  %296 = vst [vmem:[#allocation1] ss:$4 sm:$0xff] %v262_v49  ;;  %v697_v56 = vor.u32 %v741_v46, %v694_v47  ;;  %v693_v61 = vor.u32 %v742_v51, %v692_v50 }
  0x4a   : > { %478 = vmatpush.bf16.msra.mxu3 %v713_v29  ;;  %452 = vmatpush.bf16.msra.mxu1 %v709_v36  ;;  %v727_v57 = vld [vmem:[%s1096_s14 + $0x24] sm:$0xf]  ;;  %v638_v58 = vld [vmem:[%s1096_s14 + $0x28] sm:$0xf0]  ;;  %v289_v62 = vld [vmem:[%s1199_s3] sm:$0xf]  ;;  %v637_v2 = vor.u32 %v728_v54, %v636_v53 }
  0x4b   : > { %v739_v59 = vld [vmem:[%s1096_s14 + $0x84] sm:$0xf]  ;;  %v686_v60 = vld [vmem:[%s1096_s14 + $0x88] sm:$0xf0]  ;;  %v684_v63 = vld [vmem:[%s1096_s14 + $0x80] sm:$0xf]  ;;  %292 = vperm.xlu0 %805, %v289_v62   ;;  %v641_v3 = vor.u32 %v727_v57, %v638_v58 }
  0x4c   : > { %438 = vmatpush.bf16.msra.mxu0 %v653_v37  ;;  %v740_v0 = vld [vmem:[%s1096_s14 + $0x84] sm:$0xf0]  ;;  %v689_v4 = vor.u32 %v739_v59, %v686_v60  ;;  %v628_v5 = vld [vmem:[%s1096_s14 + $0x10] sm:$0xf]  ;;  %v726_v6 = vld [vmem:[%s1096_s14 + $0x14] sm:$0xf0] }
  0x4d   : > { %464 = vmatpush.bf16.msra.mxu2 %v657_v40  ;;  %v725_v7 = vld [vmem:[%s1096_s14 + $0x14] sm:$0xf]  ;;  %v630_v8 = vld [vmem:[%s1096_s14 + $0x18] sm:$0xf0]  ;;  %v685_v9 = vor.u32 %v740_v0, %v684_v63  ;;  %v629_v10 = vor.u32 %v726_v6, %v628_v5  ;;  %v620_v11 = vld [vmem:[%s1096_s14] sm:$0xf] }
  0x4e   : > { %479 = vmatpush.bf16.msra.mxu3 %v705_v41  ;;  %453 = vmatpush.bf16.msra.mxu1 %v701_v48  ;;  %v633_v12 = vor.u32 %v725_v7, %v630_v8  ;;  %vm425_vm1 = vcmask 588800   ;;  %v724_v14 = vld [vmem:[%s1096_s14 + $0x4] sm:$0xf0]  ;;  %v723_v15 = vld [vmem:[%s1096_s14 + $0x4] sm:$0xf]  ;;  %s747_s9 = sshll.u32 %s992_s19, 3 }
  0x4f   : > { %v622_v16 = vld [vmem:[%s1096_s14 + $0x8] sm:$0xf0]  ;;  %v621_v17 = vor.u32 %v724_v14, %v620_v11  ;;  %s509_s13 = scalar_lea.hbm %s1200_s4, %s747_s9  ;;  %v288_v34 = vld [vmem:[%s1088_s24] sm:$0xff]  ;;  %s257_s7 = scalar_lea.vmem [#allocation7], %s616_s10 }
  0x50   : > { %439 = vmatpush.bf16.msra.mxu0 %v645_v52  ;;  %v298_v13 = vld.sshfl [vmem:[#allocation1 + $0x8] sm:$0xff pattern:$0x73625140]  ;;  %v625_v18 = vor.u32 %v723_v15, %v622_v16  ;;  %v297_v19 = vld.sshfl [vmem:[#allocation1] sm:$0xff pattern:$0x73625140] }
  0x51   : > { %465 = vmatpush.bf16.msra.mxu2 %v649_v55  ;;  %s511_s29 = sshll.u32 %s257_s7, 4  ;;  %s513_s5 = sshll.u32 %s509_s13, 4  ;;  %s512_s29 = int_to_ptr.vmem [resolvable:$true] %s511_s29  ;;  %s514_s5 = int_to_ptr.hbm [resolvable:$true] %s513_s5 }
  0x52   : > { %480 = vmatpush.bf16.msra.mxu3 %v697_v56  ;;  %454 = vmatpush.bf16.msra.mxu1 %v693_v61  ;;  %s498_s19 = scalar_lea.sflag [#allocation4], %s1082_s8  ;;  %s884_s25 = sshra.s32 %s514_s5, 4  ;;  %s885_s25 = int_to_ptr.hbm [resolvable:$true] %s884_s25 }
  0x53   : > { %s886_s30 = scalar_lea.hbm %s885_s25, 8  ;;  %s890_s23 = scalar_lea.hbm %s1200_s4, 16 }
  0x54   : > { %440 = vmatpush.bf16.msra.mxu0 %v637_v2  ;;  %p887_p6 = scmp.ne.s32.totalorder %s885_s25, %s886_s30  ;;  %p891_p2 = scmp.lt.s32.totalorder %s885_s25, %s1200_s4 }
  0x55   : > { %466 = vmatpush.bf16.msra.mxu2 %v641_v3  ;;  %p892_p3 = scmp.lt.s32.totalorder %s890_s23, %s886_s30 }
  0x56   : > { %481 = vmatpush.bf16.msra.mxu3 %v689_v4  ;;  %455 = vmatpush.bf16.msra.mxu1 %v685_v9  ;;  %p888_p13 = pnand %p887_p6, %p1021_p11 }
  0x57   : > { %p893_p4 = por %p892_p3, %p891_p2 }
  0x58   : > { %441 = vmatpush.bf16.msra.mxu0 %v629_v10  ;;  %p889_p1 = pneg %p888_p13 }
  0x59   : > { %715 = vmatmul.msk.bf16.vlgmr.msra.gmra.mxu3 %vm425_vm1, %v298_v13  ;;  %467 = vmatpush.bf16.msra.mxu2 %v633_v12 }
  0x5a   : > { %714 = vmatmul.msk.bf16.vlgmr.msra.gmra.mxu1 %vm425_vm1, %v298_v13  ;;  %p894_p5 = pnand %p893_p4, %p889_p1 }
  0x5c   : > { %442 = vmatpush.bf16.msra.mxu0 %v621_v17 }
  0x5d   : > { %468 = vmatpush.bf16.msra.mxu2 %v625_v18 }
  0x5f   : > { %443 = vmatmul.bf16.vlgmr.msra.gmra.mxu0 %v297_v19 }
  0x60   : > { %469 = vmatmul.bf16.vlgmr.msra.gmra.mxu2 %v297_v19 }
  0xbd   : > { %v293_v24 = vpop.permute.xlu0 %292 }
  0xd7   : > { %v457_v20 = vpop.f32.mrf.mxu1 }
  0xdc   : > { %v483_v21 = vpop.f32.mrf.mxu3  ;;  %v444_v22 = vpop.f32.mrf.mxu0 }
  0xdd   : > { %v445_v25 = vadd.f32 %v444_v22, %v293_v24 }
  0xdf   : > { %v459_v23 = vpop.f32.mrf.mxu1  ;;  %v458_v30 = vadd.f32 %v457_v20, %v445_v25 }
  0xe3   : > { %v470_v26 = vpop.f32.mrf.mxu2 }
  0xe4   : > { %v485_v27 = vpop.f32.mrf.mxu3  ;;  %v471_v28 = vadd.f32 %v470_v26, %v293_v24  ;;  %v446_v29 = vpop.f32.mrf.mxu0 }
  0xe6   : > { %v484_v31 = vadd.f32 %v483_v21, %v471_v28 }
  0xe8   : > { %806 = vtanh.f32 %v484_v31 }
  0xe9   : > { %808 = vtanh.f32 %v458_v30 }
  0xeb   : > { %v472_v32 = vpop.f32.mrf.mxu2 }
  0xee   : > { %v807_v33 = vpop.eup %806 }
  0xef   : > { %v491_v35 = vrot.slane %v807_v33, 4  ;;  %v809_v36 = vpop.eup %808 }
  0xf1   : > { %v492_v37 = vsel %vm428_vm0, %v809_v36, %v491_v35 }
  0xf2   : > { %v494_v38 = vsub.f32 %v288_v34, %v492_v37 }
  0xf4   : > { %v495_v39 = vmax.f32 %v494_v38, 0.0 }
  0xf6   : > { %496 = vst [vmem:[%s257_s7] sm:$0xff] %v495_v39 }
  0xf7   : > { %897 = shalt.err (!%p894_p5)
}
  0xf8   : > { %754 = dma.vmem_to_hbm [thread:$0]  (%p1021_p11), %s512_s29, 128, %s514_s5, %s498_s19  }
  0xf9 PF: > { %s525_s8 = sand.u32 1, %s928_s15   ;;  %p764_p7 = pnand %p609_p9, %p1025_p12 }
  0xfa   : > { %s526_s26 = scalar_lea.sflag [#allocation4], %s525_s8 }
  0xfb   : > { %p765_p8 = pneg %p764_p7 }
  0xfd   : > { %923 = dma.done.wait (%p765_p8), %s526_s26, 128  }
  0xfe   : > { %925 = vsyncadd (%p765_p8), %s526_s26, 4294967168  ;;  %s1210_s20 = sld [smem:[#allocation11_spill]]  ;;  %p20_p10 = scmp.ge.s32.totalorder %s996_s21, 4  }
  0xff   : > { %s1211_s17 = sld [smem:[#allocation12_spill]]  ;;  %s1212_s15 = smov %s932_s16 }
 0x100   : > { %s1214_s18 = smov %s996_s21  ;;  %22 = sbr.rel (!%p20_p10) target bundleno = 7 (0x7), region = 94 }
 0x104   : > { %s1213_s16 = smov %s1210_s20 }
 0x105   :  { %532 = vsyncpa [#allocation3], 1 }
 0x106   :  { %534 = vsyncpa [#allocation3 + $0x1], 1 }
 0x107   :  { %535 = vsyncpa [#allocation6], 1 }
 0x108   :  { %537 = vsyncpa [#allocation6 + $0x1], 1 }
 0x109   :  { %538 = vsyncpa [#allocation4], 1 }
 0x10a   :  { %540 = vsyncpa [#allocation4 + $0x1], 1 }

</bundles_post_ra>
